<compile_context>
chip_gen: v7x
topology: tpu7x:2x2x1
jax: 0.10.0
libtpu: 0.0.40
codegen_flags: <defaults>
</compile_context>

<pallas_src>
import functools

import jax
import jax.numpy as jnp
from jax import lax
from jax.experimental import pallas as pl
from jax.experimental.pallas import tpu as pltpu


def _round_up(n, m):
    return (n + m - 1) // m * m


def _use_bf16_activations():
    """bf16 VPU exists on v6e/v7x; keep f32 elementwise math on older gens."""
    try:
        kind = jax.devices()[0].device_kind.lower()
    except Exception:
        return False
    return not any(tag in kind for tag in ("v2", "v3", "v4", "v5"))


def mlp_kernel(x_ref, w1_ref, b1_ref, w2_ref, b2_ref,
               w3_ref, b3_ref, w4_ref, b4_ref, o_ref, *, act_dtype):
    """Fused MLP, feature-major activations: (features, batch_tile)."""
    # x arrives exactly as stored in HBM: (T, 27) float32.  Cast in-kernel.
    x = x_ref[...].astype(jnp.bfloat16)                              # (T, 27)

    def bias_relu(acc_f32, b_ref):
        a = acc_f32.astype(act_dtype) + b_ref[...].astype(act_dtype)
        return jnp.maximum(a, 0).astype(jnp.bfloat16)

    # Layer 1: contract the feature dim of both operands (Q @ K^T pattern) so
    # the MXU consumes the (T, 27) operand without an explicit transpose.
    h1 = lax.dot_general(w1_ref[...], x, (((1,), (1,)), ((), ())),
                         preferred_element_type=jnp.float32)         # (128, T)
    h1 = bias_relu(h1, b1_ref)

    h2 = jnp.dot(w2_ref[...], h1, preferred_element_type=jnp.float32)  # (64, T)
    h2 = bias_relu(h2, b2_ref)

    h3 = jnp.dot(w3_ref[...], h2, preferred_element_type=jnp.float32)  # (32, T)
    h3 = jnp.maximum(h3 + b3_ref[...], 0.0)                            # f32

    # Final Linear(32, 1): VPU multiply + sublane (XLU) reduction instead of an
    # M=1 MXU matmul; result is already a lane-dense (1, T) row.
    z = jnp.sum(h3 * w4_ref[...], axis=0, keepdims=True) + b4_ref[...]
    o_ref[...] = jax.nn.sigmoid(z).astype(o_ref.dtype)


def hepmass_forward(x, params, *, batch_tile=8192):
    """x: (B, 27) float32. params: torch-layout weights (out,in) / biases (out,)."""
    B, F = x.shape
    assert F == 27

    # Tile multiple of 128 (lane-dense output stores); clamp to the batch so
    # tiny inputs don't allocate an oversized pipeline buffer.
    tile = max(128, min(_round_up(batch_tile, 128), _round_up(B, 128)))
    n_tiles = pl.cdiv(B, tile)
    B_pad = n_tiles * tile

    act_dtype = jnp.bfloat16 if _use_bf16_activations() else jnp.float32

    # MXU operands in bf16; bias / final-layer vectors stay f32.
    w1 = params["w1"].astype(jnp.bfloat16)                     # (128, 27)
    w2 = params["w2"].astype(jnp.bfloat16)                     # (64, 128)
    w3 = params["w3"].astype(jnp.bfloat16)                     # (32, 64)
    w4 = params["w4"].reshape(32, 1).astype(jnp.float32)       # (32, 1)
    b1 = params["b1"].reshape(128, 1).astype(jnp.float32)
    b2 = params["b2"].reshape(64, 1).astype(jnp.float32)
    b3 = params["b3"].reshape(32, 1).astype(jnp.float32)
    b4 = params["b4"].reshape(1, 1).astype(jnp.float32)

    # Constant index_map -> fetched once, never re-DMA'd across grid steps.
    full = lambda a: pl.BlockSpec(a.shape, lambda i: (0, 0))

    kernel = functools.partial(mlp_kernel, act_dtype=act_dtype)

    out = pl.pallas_call(
        kernel,
        out_shape=jax.ShapeDtypeStruct((1, B_pad), jnp.float32),
        grid_spec=pltpu.PrefetchScalarGridSpec(
            num_scalar_prefetch=0,
            grid=(n_tiles,),
            in_specs=[
                # x streamed straight from HBM; last block may be partial
                # (OOB rows only pollute padded output lanes, sliced below).
                pl.BlockSpec((tile, F), lambda i: (i, 0)),
                full(w1), full(b1),
                full(w2), full(b2),
                full(w3), full(b3),
                full(w4), full(b4),
            ],
            out_specs=pl.BlockSpec((1, tile), lambda i: (0, i)),
        ),
        compiler_params=pltpu.CompilerParams(
            dimension_semantics=("parallel",),
            # 8k-sample tiles need ~20 MiB live VMEM; raise above v5e's 16 MiB
            # default scoped limit (well under physical VMEM on all gens).
            vmem_limit_bytes=48 * 1024 * 1024,
        ),
    )(x, w1, b1, w2, b2, w3, b3, w4, b4)

    # Drop batch padding, restore (B, 1) column output.
    return out[0, :B][:, None]


def init_params(key):
    """Deterministic synthetic parameters in torch layout: W (out,in), b (out,)."""
    sizes = [(128, 27), (64, 128), (32, 64), (1, 32)]
    params = {}
    for idx, (fout, fin) in enumerate(sizes, start=1):
        key, kw, kb = jax.random.split(key, 3)
        bound = 1.0 / jnp.sqrt(fin)
        params[f"w{idx}"] = jax.random.uniform(
            kw, (fout, fin), jnp.float32, minval=-bound, maxval=bound)
        params[f"b{idx}"] = jax.random.uniform(
            kb, (fout,), jnp.float32, minval=-bound, maxval=bound)
    return params


def reference_forward(x, params):
    h = x
    for idx in range(1, 4):
        h = jnp.maximum(h @ params[f"w{idx}"].T + params[f"b{idx}"], 0.0)
    return jax.nn.sigmoid(h @ params["w4"].T + params["b4"])


if __name__ == "__main__":
    key = jax.random.PRNGKey(0)
    kx, kp = jax.random.split(key)

    B = 1000  # deliberately not a tile multiple: exercises partial-last-block path
    x = jax.random.normal(kx, (B, 27), jnp.float32)
    params = init_params(kp)

    # Small-shape smoke test: batch_tile=512 -> 2 equal grid steps (even count
    # keeps both v7x TensorCores busy).  Production default is 8192.
    out = hepmass_forward(x, params, batch_tile=512)
    out = jax.block_until_ready(out)

    ref = reference_forward(x, params)
    assert out.shape == (B, 1)
    err = float(jnp.max(jnp.abs(out - ref)))
    # bf16 MXU inputs with f32 accumulation -> relaxed tolerance vs f32 reference.
    assert err < 3e-2, f"mismatch vs reference: max abs err = {err}"

    print("KERNEL_OK")
</pallas_src>

<mosaic_0001>
module attributes {stable_mosaic.version = 11 : i64} {
  func.func @mlp_kernel(%arg0: i32, %arg1: memref<512x27xf32, #tpu.memory_space<vmem>>, %arg2: memref<128x27xbf16, #tpu.memory_space<vmem>>, %arg3: memref<128x1xf32, #tpu.memory_space<vmem>>, %arg4: memref<64x128xbf16, #tpu.memory_space<vmem>>, %arg5: memref<64x1xf32, #tpu.memory_space<vmem>>, %arg6: memref<32x64xbf16, #tpu.memory_space<vmem>>, %arg7: memref<32x1xf32, #tpu.memory_space<vmem>>, %arg8: memref<32x1xf32, #tpu.memory_space<vmem>>, %arg9: memref<1x1xf32, #tpu.memory_space<vmem>>, %arg10: memref<1x512xf32, #tpu.memory_space<vmem>>) attributes {dimension_semantics = [#tpu.dimension_semantics<parallel>], iteration_bounds = array<i64: 2>, scalar_prefetch = 0 : i64, scratch_operands = 0 : i64, tpu.core_type = #tpu.core_type<tc>, window_params = [{transform_indices = @transform_0, window_bounds = array<i64: 512, 27>}, {pipeline_mode = #tpu.pipeline_mode<synchronous>, transform_indices = @transform_1, window_bounds = array<i64: 128, 27>}, {pipeline_mode = #tpu.pipeline_mode<synchronous>, transform_indices = @transform_2, window_bounds = array<i64: 128, 1>}, {pipeline_mode = #tpu.pipeline_mode<synchronous>, transform_indices = @transform_3, window_bounds = array<i64: 64, 128>}, {pipeline_mode = #tpu.pipeline_mode<synchronous>, transform_indices = @transform_4, window_bounds = array<i64: 64, 1>}, {pipeline_mode = #tpu.pipeline_mode<synchronous>, transform_indices = @transform_5, window_bounds = array<i64: 32, 64>}, {pipeline_mode = #tpu.pipeline_mode<synchronous>, transform_indices = @transform_6, window_bounds = array<i64: 32, 1>}, {pipeline_mode = #tpu.pipeline_mode<synchronous>, transform_indices = @transform_7, window_bounds = array<i64: 32, 1>}, {pipeline_mode = #tpu.pipeline_mode<synchronous>, transform_indices = @transform_8, window_bounds = array<i64: 1, 1>}, {transform_indices = @transform_9, window_bounds = array<i64: 1, 512>}]} {
    %c0 = arith.constant 0 : index
    %c0_0 = arith.constant 0 : index
    %0 = vector.load %arg1[%c0, %c0_0] : memref<512x27xf32, #tpu.memory_space<vmem>>, vector<512x27xf32>
    %1 = arith.truncf %0 : vector<512x27xf32> to vector<512x27xbf16>
    %c0_1 = arith.constant 0 : index
    %c0_2 = arith.constant 0 : index
    %2 = vector.load %arg2[%c0_1, %c0_2] : memref<128x27xbf16, #tpu.memory_space<vmem>>, vector<128x27xbf16>
    %cst = arith.constant dense<0.000000e+00> : vector<128x512xf32>
    %3 = tpu.matmul %2, %1, %cst {dimension_numbers = #tpu.dot_dimension_numbers<[1], [1], [0], [0], [0, 0, 1, 0], [], []>} : vector<128x27xbf16>, vector<512x27xbf16>, vector<128x512xf32> -> vector<128x512xf32>
    %4 = arith.truncf %3 : vector<128x512xf32> to vector<128x512xbf16>
    %c0_3 = arith.constant 0 : index
    %c0_4 = arith.constant 0 : index
    %5 = vector.load %arg3[%c0_3, %c0_4] : memref<128x1xf32, #tpu.memory_space<vmem>>, vector<128x1xf32>
    %6 = arith.truncf %5 : vector<128x1xf32> to vector<128x1xbf16>
    %7 = vector.broadcast %6 : vector<128x1xbf16> to vector<128x512xbf16>
    %8 = arith.addf %4, %7 : vector<128x512xbf16>
    %cst_5 = arith.constant 0.000000e+00 : bf16
    %9 = vector.broadcast %cst_5 : bf16 to vector<128x512xbf16>
    %10 = arith.maximumf %8, %9 : vector<128x512xbf16>
    %c0_6 = arith.constant 0 : index
    %c0_7 = arith.constant 0 : index
    %11 = vector.load %arg4[%c0_6, %c0_7] : memref<64x128xbf16, #tpu.memory_space<vmem>>, vector<64x128xbf16>
    %cst_8 = arith.constant dense<0.000000e+00> : vector<64x512xf32>
    %12 = tpu.matmul %11, %10, %cst_8 {dimension_numbers = #tpu.dot_dimension_numbers<[1], [0], [0], [1], [0, 0, 1, 1], [], []>} : vector<64x128xbf16>, vector<128x512xbf16>, vector<64x512xf32> -> vector<64x512xf32>
    %13 = arith.truncf %12 : vector<64x512xf32> to vector<64x512xbf16>
    %c0_9 = arith.constant 0 : index
    %c0_10 = arith.constant 0 : index
    %14 = vector.load %arg5[%c0_9, %c0_10] : memref<64x1xf32, #tpu.memory_space<vmem>>, vector<64x1xf32>
    %15 = arith.truncf %14 : vector<64x1xf32> to vector<64x1xbf16>
    %16 = vector.broadcast %15 : vector<64x1xbf16> to vector<64x512xbf16>
    %17 = arith.addf %13, %16 : vector<64x512xbf16>
    %cst_11 = arith.constant 0.000000e+00 : bf16
    %18 = vector.broadcast %cst_11 : bf16 to vector<64x512xbf16>
    %19 = arith.maximumf %17, %18 : vector<64x512xbf16>
    %c0_12 = arith.constant 0 : index
    %c0_13 = arith.constant 0 : index
    %20 = vector.load %arg6[%c0_12, %c0_13] : memref<32x64xbf16, #tpu.memory_space<vmem>>, vector<32x64xbf16>
    %cst_14 = arith.constant dense<0.000000e+00> : vector<32x512xf32>
    %21 = tpu.matmul %20, %19, %cst_14 {dimension_numbers = #tpu.dot_dimension_numbers<[1], [0], [0], [1], [0, 0, 1, 1], [], []>} : vector<32x64xbf16>, vector<64x512xbf16>, vector<32x512xf32> -> vector<32x512xf32>
    %c0_15 = arith.constant 0 : index
    %c0_16 = arith.constant 0 : index
    %22 = vector.load %arg7[%c0_15, %c0_16] : memref<32x1xf32, #tpu.memory_space<vmem>>, vector<32x1xf32>
    %23 = vector.broadcast %22 : vector<32x1xf32> to vector<32x512xf32>
    %24 = arith.addf %21, %23 : vector<32x512xf32>
    %cst_17 = arith.constant 0.000000e+00 : f32
    %25 = vector.broadcast %cst_17 : f32 to vector<32x512xf32>
    %26 = arith.maximumf %24, %25 : vector<32x512xf32>
    %c0_18 = arith.constant 0 : index
    %c0_19 = arith.constant 0 : index
    %27 = vector.load %arg8[%c0_18, %c0_19] : memref<32x1xf32, #tpu.memory_space<vmem>>, vector<32x1xf32>
    %28 = vector.broadcast %27 : vector<32x1xf32> to vector<32x512xf32>
    %29 = arith.mulf %26, %28 : vector<32x512xf32>
    %cst_20 = arith.constant dense<0.000000e+00> : vector<512xf32>
    %30 = vector.multi_reduction <add>, %29, %cst_20 [0] : vector<32x512xf32> to vector<512xf32>
    %31 = vector.shape_cast %30 : vector<512xf32> to vector<1x512xf32>
    %c0_21 = arith.constant 0 : index
    %c0_22 = arith.constant 0 : index
    %32 = vector.load %arg9[%c0_21, %c0_22] : memref<1x1xf32, #tpu.memory_space<vmem>>, vector<1x1xf32>
    %33 = vector.broadcast %32 : vector<1x1xf32> to vector<1x512xf32>
    %34 = arith.addf %31, %33 : vector<1x512xf32>
    %35 = arith.negf %34 : vector<1x512xf32>
    %36 = math.exp %35 : vector<1x512xf32>
    %cst_23 = arith.constant 1.000000e+00 : f32
    %37 = vector.broadcast %cst_23 : f32 to vector<1x512xf32>
    %38 = arith.addf %37, %36 : vector<1x512xf32>
    %39 = arith.divf %37, %38 : vector<1x512xf32>
    %c0_24 = arith.constant 0 : index
    %c0_25 = arith.constant 0 : index
    %40 = vector.load %arg10[%c0_24, %c0_25] : memref<1x512xf32, #tpu.memory_space<vmem>>, vector<1x512xf32>
    tpu.vector_store %arg10[%c0_24, %c0_25], %39 {strides = array<i32>} : memref<1x512xf32, #tpu.memory_space<vmem>>, vector<1x512xf32>,
    return
  }
  func.func @transform_0(%arg0: i32) -> (i32, i32) {
    %c0_i32 = arith.constant 0 : i32
    %c0_i32_0 = arith.constant 0 : i32
    return %arg0, %c0_i32 : i32, i32
  }
  func.func @transform_1(%arg0: i32) -> (i32, i32) {
    %c0_i32 = arith.constant 0 : i32
    %c0_i32_0 = arith.constant 0 : i32
    %c0_i32_1 = arith.constant 0 : i32
    return %c0_i32, %c0_i32_0 : i32, i32
  }
  func.func @transform_2(%arg0: i32) -> (i32, i32) {
    %c0_i32 = arith.constant 0 : i32
    %c0_i32_0 = arith.constant 0 : i32
    %c0_i32_1 = arith.constant 0 : i32
    return %c0_i32, %c0_i32_0 : i32, i32
  }
  func.func @transform_3(%arg0: i32) -> (i32, i32) {
    %c0_i32 = arith.constant 0 : i32
    %c0_i32_0 = arith.constant 0 : i32
    %c0_i32_1 = arith.constant 0 : i32
    return %c0_i32, %c0_i32_0 : i32, i32
  }
  func.func @transform_4(%arg0: i32) -> (i32, i32) {
    %c0_i32 = arith.constant 0 : i32
    %c0_i32_0 = arith.constant 0 : i32
    %c0_i32_1 = arith.constant 0 : i32
    return %c0_i32, %c0_i32_0 : i32, i32
  }
  func.func @transform_5(%arg0: i32) -> (i32, i32) {
    %c0_i32 = arith.constant 0 : i32
    %c0_i32_0 = arith.constant 0 : i32
    %c0_i32_1 = arith.constant 0 : i32
    return %c0_i32, %c0_i32_0 : i32, i32
  }
  func.func @transform_6(%arg0: i32) -> (i32, i32) {
    %c0_i32 = arith.constant 0 : i32
    %c0_i32_0 = arith.constant 0 : i32
    %c0_i32_1 = arith.constant 0 : i32
    return %c0_i32, %c0_i32_0 : i32, i32
  }
  func.func @transform_7(%arg0: i32) -> (i32, i32) {
    %c0_i32 = arith.constant 0 : i32
    %c0_i32_0 = arith.constant 0 : i32
    %c0_i32_1 = arith.constant 0 : i32
    return %c0_i32, %c0_i32_0 : i32, i32
  }
  func.func @transform_8(%arg0: i32) -> (i32, i32) {
    %c0_i32 = arith.constant 0 : i32
    %c0_i32_0 = arith.constant 0 : i32
    %c0_i32_1 = arith.constant 0 : i32
    return %c0_i32, %c0_i32_0 : i32, i32
  }
  func.func @transform_9(%arg0: i32) -> (i32, i32) {
    %c0_i32 = arith.constant 0 : i32
    %c0_i32_0 = arith.constant 0 : i32
    return %c0_i32, %arg0 : i32, i32
  }
}

</mosaic_0001>

<bundles_post_ra>
// kernel: tpu_custom_call.1
= control target key start
LH: loop header
LB: loop body
LE: loop exit
PB: predicated region body
PF: predicated region fallthrough
CT: control target
= control target key end

     0   :  { %s2424_s0 = inlined_call_operand.vmem [shape: f32[1000,27], index: 0, kind: input, shape index: {}]   ;;  %s2425_s1 = inlined_call_operand.vmem [shape: bf16[128,27], index: 1, kind: input, shape index: {}]   ;;  %s2426_s2 = inlined_call_operand.vmem [shape: f32[128,1], index: 2, kind: input, shape index: {}]   ;;  %s2427_s3 = inlined_call_operand.vmem [shape: bf16[64,128], index: 3, kind: input, shape index: {}]   ;;  %s2428_s4 = inlined_call_operand.vmem [shape: f32[64,1], index: 4, kind: input, shape index: {}]   ;;  %s2429_s5 = inlined_call_operand.vmem [shape: bf16[32,64], index: 5, kind: input, shape index: {}]   ;;  %s2430_s6 = inlined_call_operand.vmem [shape: f32[32,1], index: 6, kind: input, shape index: {}]   ;;  %s2431_s7 = inlined_call_operand.vmem [shape: f32[32,1], index: 7, kind: input, shape index: {}]   ;;  %s2432_s8 = inlined_call_operand.<no memory space> [shape: f32[1,1], index: 8, kind: input, shape index: {}]   ;;  %s2433_s9 = inlined_call_operand.hbm [shape: f32[1,1024], index: 9, kind: output, shape index: {}]  }
   0x1   :  { %v14_v0 = vstv %s2432_s8 }
   0x2   :  { %15 = vst [vmem:[#allocation2] sm:$0x1] %v14_v0 }
   0x3   :  { %16 = vsyncpa [#allocation4], 0 }
   0x4   :  { %18 = vsyncpa [#allocation4 + $0x1], 0  ;;  %s1987_s11 = smov 0   ;;  %s1989_s12 = smov 0  }
   0x5   :  { %s1991_s13 = smov 0   ;;  %s1993_s14 = smov 0  }
   0x6 LB: > { %s1662_s8 = sadd.s32 4294967295, %s1929_s14   ;;  %s1663_s15 = sadd.s32 4294967294, %s1929_s14   ;;  %s1929_s14 = sphi %s1993_s14, %s2439_s14   ;;  %s1925_s13 = sphi %s1991_s13, %s2438_s13   ;;  %s1921_s12 = sphi %s1989_s12, %s2437_s12   ;;  %s1917_s11 = sphi %s1987_s11, %s2436_s11  }
   0x7   : > { %s2010_s16 = sadd.s32 1, %s1929_s14   ;;  %s225_s17 = sadd.s32 1, %s1925_s13 }
   0x8   : > { %s222_s18 = ssub.s32 %s1929_s14, %s2010_s16  ;;  %p235_p0 = scmp.ne.s32.totalorder %s1925_s13, %s1921_s12 }
   0x9   : > { %p223_p1 = scmp.eq.s32.totalorder %s222_s18, 0  ;;  %p236_p2 = scmp.eq.s32.totalorder %s1662_s8, 1 }
   0xa   : > { %p241_p3 = scmp.ne.s32.totalorder %s1921_s12, %s1917_s11  ;;  %p242_p4 = scmp.eq.s32.totalorder %s1663_s15, 1 }
   0xb   : > { %s2020_s19 = scalar_select %p223_p1, %s1925_s13, %s225_s17  }
   0xc   : > { %p2022_p5 = por %p236_p2, %p235_p0  ;;  %p2026_p6 = por %p242_p4, %p241_p3 }
   0xd   : > { %p1666_p7 = scmp.ge.s32.totalorder %s1929_s14, 1  ;;  %p301_p8 = scmp.lt.s32.totalorder %s1929_s14, 3 }
   0xf   : > { %p302_p9 = pnand %p1666_p7, %p301_p8 }
  0x10   : > { %s2032_s22 = sshll.u32 (!%p302_p9), %s1662_s8, 6  ;;  %v2038_v1 = vld [vmem:[%s2425_s1] sm:$0xff] (!%p302_p9)   ;;  %vm509_vm0 = vcmask (!%p302_p9), 220160   ;;  %v1931_v2 = vmov (!%p302_p9), 0   ;;  %v889_v59 = vld [vmem:[%s2426_s2 + $0x8] sm:$0xff] (!%p302_p9)  ;;  %v890_v60 = vld [vmem:[%s2426_s2 + $0x10] sm:$0xff] (!%p302_p9) }
  0x11   : > { %305 = sbr.rel (%p302_p9) target bundleno = 922 (0x39a), region = 56  ;;  %p346_p10 = scmp.lt.s32.totalorder (!%p302_p9), %s2032_s22, 124  ;;  %1730 = vmatprep.mubr.msk.bf16.mxu0 (!%p302_p9), %vm509_vm0, %v2038_v1  ;;  %1762 = vmatprep.mubr.msk.bf16.mxu1 (!%p302_p9), %vm509_vm0, %v2038_v1  ;;  %v888_v57 = vld [vmem:[%s2426_s2] sm:$0xff] (!%p302_p9)  ;;  %v891_v61 = vld [vmem:[%s2426_s2 + $0x18] sm:$0xff] (!%p302_p9)  ;;  %vm1312_vm1 = vcmask (!%p302_p9), 523264  }
  0x12   : > { %1835 = vset.pattern.permute.xlu0 (!%p302_p9), %v1931_v2  ;;  %1836 = vset.pattern.permute.xlu1 (!%p302_p9), %v1931_v2  ;;  %v904_v0 = vpack.c.bf16 (!%p302_p9), %v889_v59, %v888_v57  ;;  %v1213_v57 = vld [vmem:[%s2428_s4 + $0x18] sm:$0xff] (!%p302_p9)  ;;  %s338_s15 = sand.u32 (!%p302_p9), 1, %s1921_s12   ;;  %s1933_s28 = smov (!%p302_p9), [#allocation3]  }
  0x13   : > { %s1667_s17 = sshll.u32 (!%p302_p9), %s338_s15, 2  ;;  %s1871_s30 = sshll.u32 (!%p302_p9), %s1933_s28, 4  ;;  %s1872_s30 = int_to_ptr.vmem [resolvable:$false] %s1871_s30 }
  0x14   : > { %914 = vperm.xlu0 (!%p302_p9), %1835, %v904_v0   ;;  %s340_s18 = scalar_lea.vmem (!%p302_p9), [#allocation3], %s1667_s17  ;;  %s1873_s10 = scalar_lea.vmem (!%p302_p9), %s1872_s30, 128 }
  0x15   : > { %s1604_s23 = sshll.u32 (!%p302_p9), %s340_s18, 4  ;;  %s2384_s23 = int_to_ptr.vmem [resolvable:$true] %s1604_s23 }
  0x16   : > { %s1867_s27 = scalar_lea.vmem (!%p302_p9), %s2384_s23, 64  ;;  %p1874_p0 = scmp.lt.s32.totalorder (!%p302_p9), %s2384_s23, %s1872_s30 }
  0x17   : > { %p1868_p11 = scmp.ne.s32.totalorder (!%p302_p9), %s2384_s23, %s1867_s27  ;;  %p1875_p1 = scmp.lt.s32.totalorder (!%p302_p9), %s1873_s10, %s1867_s27 }
  0x18   : > { %s347_s25 = scalar_select %p346_p10, %s2032_s22, 124 }
  0x19   : > { %p1869_p12 = pnand %p1868_p11, %p2022_p5  ;;  %p1876_p2 = por %p1875_p1, %p1874_p0 }
  0x1a   : > { %s1669_s26 = sshll.u32 %s347_s25, 3 }
  0x1b   : > { %s2050_s29 = scalar_lea.vmem %s2424_s0, %s1669_s26  ;;  %s1590_s26 = scalar_lea.sflag [#allocation4], %s338_s15 }
  0x1c   : > { %v373_v3 = vld [vmem:[%s2050_s29 + $0x80] sm:$0xff]  ;;  %v374_v4 = vld [vmem:[%s2050_s29 + $0x88] sm:$0xff]  ;;  %v375_v14 = vld [vmem:[%s2050_s29 + $0x90] sm:$0xff]  ;;  %p1870_p13 = pneg %p1869_p12 }
  0x1d   : > { %v405_v5 = vld [vmem:[%s2050_s29 + $0x180] sm:$0xff]  ;;  %v429_v6 = vpack.c.bf16 %v374_v4, %v373_v3  ;;  %v406_v7 = vld [vmem:[%s2050_s29 + $0x188] sm:$0xff]  ;;  %v376_v16 = vld [vmem:[%s2050_s29 + $0x98] sm:$0xff] }
  0x1e   : > { %v357_v8 = vld [vmem:[%s2050_s29] sm:$0xff]  ;;  %v358_v9 = vld [vmem:[%s2050_s29 + $0x8] sm:$0xff]  ;;  %v445_v10 = vpack.c.bf16 %v406_v7, %v405_v5  ;;  %v407_v17 = vld [vmem:[%s2050_s29 + $0x190] sm:$0xff]  ;;  %v430_v20 = vpack.c.bf16 %v376_v16, %v375_v14  ;;  %p1877_p3 = pnand %p1876_p2, %p1870_p13 }
  0x1f   : > { %v421_v11 = vpack.c.bf16 %v358_v9, %v357_v8  ;;  %v389_v12 = vld [vmem:[%s2050_s29 + $0x100] sm:$0xff]  ;;  %v390_v13 = vld [vmem:[%s2050_s29 + $0x108] sm:$0xff]  ;;  %1778 = vmatprep.subr.msk.bf16.mxu0 %vm509_vm0, %v429_v6  ;;  %v408_v18 = vld [vmem:[%s2050_s29 + $0x198] sm:$0xff]  ;;  %v905_v8 = vpack.c.bf16 %v891_v61, %v890_v60 }
  0x20   : > { %v437_v15 = vpack.c.bf16 %v390_v13, %v389_v12  ;;  %1786 = vmatprep.subr.msk.bf16.mxu1 %vm509_vm0, %v445_v10  ;;  %v446_v21 = vpack.c.bf16 %v408_v18, %v407_v17  ;;  %v359_v22 = vld [vmem:[%s2050_s29 + $0x10] sm:$0xff]  ;;  %v360_v23 = vld [vmem:[%s2050_s29 + $0x18] sm:$0xff]  ;;  %v377_v29 = vld [vmem:[%s2050_s29 + $0xa0] sm:$0xff] }
  0x21   : > { %v535_v19 = vsel %vm509_vm0, %v421_v11, 0  ;;  %v391_v24 = vld [vmem:[%s2050_s29 + $0x110] sm:$0xff]  ;;  %v392_v26 = vld [vmem:[%s2050_s29 + $0x118] sm:$0xff]  ;;  %v422_v27 = vpack.c.bf16 %v360_v23, %v359_v22  ;;  %v378_v30 = vld [vmem:[%s2050_s29 + $0xa8] sm:$0xff]  ;;  %919 = vperm.xlu0 %1835, %v905_v8  }
  0x22   : > { %1715 = vmatpush3.bf16.xpose.msra.mxu0 %v535_v19  ;;  %v583_v25 = vsel %vm509_vm0, %v437_v15, 0  ;;  %v438_v28 = vpack.c.bf16 %v392_v26, %v391_v24  ;;  %v409_v31 = vld [vmem:[%s2050_s29 + $0x1a0] sm:$0xff]  ;;  %v410_v32 = vld [vmem:[%s2050_s29 + $0x1a8] sm:$0xff]  ;;  %v431_v34 = vpack.c.bf16 %v378_v30, %v377_v29  ;;  %v379_v43 = vld [vmem:[%s2050_s29 + $0xb0] sm:$0xff] }
  0x23   : > { %1747 = vmatpush3.bf16.xpose.msra.mxu1 %v583_v25  ;;  %1779 = vmatprep.subr.msk.bf16.mxu0 %vm509_vm0, %v430_v20  ;;  %v538_v33 = vsel %vm509_vm0, %v422_v27, 0  ;;  %v447_v36 = vpack.c.bf16 %v410_v32, %v409_v31  ;;  %v361_v37 = vld [vmem:[%s2050_s29 + $0x20] sm:$0xff]  ;;  %v362_v38 = vld [vmem:[%s2050_s29 + $0x28] sm:$0xff]  ;;  %v380_v44 = vld [vmem:[%s2050_s29 + $0xb8] sm:$0xff] }
  0x24   : > { %1787 = vmatprep.subr.msk.bf16.mxu1 %vm509_vm0, %v446_v21  ;;  %v586_v35 = vsel %vm509_vm0, %v438_v28, 0  ;;  %v393_v39 = vld [vmem:[%s2050_s29 + $0x120] sm:$0xff]  ;;  %v394_v40 = vld [vmem:[%s2050_s29 + $0x128] sm:$0xff]  ;;  %v423_v41 = vpack.c.bf16 %v362_v38, %v361_v37  ;;  %v411_v45 = vld [vmem:[%s2050_s29 + $0x1b0] sm:$0xff]  ;;  %v432_v48 = vpack.c.bf16 %v380_v44, %v379_v43 }
  0x25   : > { %v439_v42 = vpack.c.bf16 %v394_v40, %v393_v39  ;;  %v412_v46 = vld [vmem:[%s2050_s29 + $0x1b8] sm:$0xff]  ;;  %v363_v51 = vld [vmem:[%s2050_s29 + $0x30] sm:$0xff]  ;;  %v381_v55 = vld [vmem:[%s2050_s29 + $0xc0] sm:$0xff] }
  0x26   : > { %v541_v47 = vsel %vm509_vm0, %v423_v41, 0  ;;  %v448_v50 = vpack.c.bf16 %v412_v46, %v411_v45  ;;  %v364_v52 = vld [vmem:[%s2050_s29 + $0x38] sm:$0xff]  ;;  %v395_v53 = vld [vmem:[%s2050_s29 + $0x130] sm:$0xff]  ;;  %v382_v56 = vld [vmem:[%s2050_s29 + $0xc8] sm:$0xff] }
  0x27   : > { %v589_v49 = vsel %vm509_vm0, %v439_v42, 0  ;;  %v396_v54 = vld [vmem:[%s2050_s29 + $0x138] sm:$0xff]  ;;  %v424_v58 = vpack.c.bf16 %v364_v52, %v363_v51  ;;  %v413_v63 = vld [vmem:[%s2050_s29 + $0x1c0] sm:$0xff]  ;;  %v414_v3 = vld [vmem:[%s2050_s29 + $0x1c8] sm:$0xff]  ;;  %v433_v11 = vpack.c.bf16 %v382_v56, %v381_v55 }
  0x28   : > { %v440_v62 = vpack.c.bf16 %v396_v54, %v395_v53  ;;  %v365_v4 = vld [vmem:[%s2050_s29 + $0x40] sm:$0xff]  ;;  %v366_v5 = vld [vmem:[%s2050_s29 + $0x48] sm:$0xff]  ;;  %v449_v16 = vpack.c.bf16 %v414_v3, %v413_v63  ;;  %v894_v18 = vld [vmem:[%s2426_s2 + $0x30] sm:$0xff] }
  0x29   : > { %v397_v6 = vld [vmem:[%s2050_s29 + $0x140] sm:$0xff]  ;;  %v398_v7 = vld [vmem:[%s2050_s29 + $0x148] sm:$0xff]  ;;  %v544_v10 = vsel %vm509_vm0, %v424_v58, 0  ;;  %v895_v19 = vld [vmem:[%s2426_s2 + $0x38] sm:$0xff]  ;;  %v425_v20 = vpack.c.bf16 %v366_v5, %v365_v4 }
  0x2a   : > { %1717 = vmatpush3.bf16.xpose.msra.mxu0 %v538_v33  ;;  %v896_v9 = vld [vmem:[%s2426_s2 + $0x40] sm:$0xff]  ;;  %v897_v12 = vld [vmem:[%s2426_s2 + $0x48] sm:$0xff]  ;;  %v592_v15 = vsel %vm509_vm0, %v440_v62, 0  ;;  %v441_v21 = vpack.c.bf16 %v398_v7, %v397_v6  ;;  %v383_v25 = vld [vmem:[%s2050_s29 + $0xd0] sm:$0xff]  ;;  %v907_v28 = vpack.c.bf16 %v895_v19, %v894_v18 }
  0x2b   : > { %1749 = vmatpush3.bf16.xpose.msra.mxu1 %v586_v35  ;;  %1780 = vmatprep.subr.msk.bf16.mxu0 %vm509_vm0, %v431_v34  ;;  %v892_v13 = vld [vmem:[%s2426_s2 + $0x20] sm:$0xff]  ;;  %v893_v14 = vld [vmem:[%s2426_s2 + $0x28] sm:$0xff]  ;;  %v908_v22 = vpack.c.bf16 %v897_v12, %v896_v9  ;;  %v384_v26 = vld [vmem:[%s2050_s29 + $0xd8] sm:$0xff]  ;;  %v547_v32 = vsel %vm509_vm0, %v425_v20, 0 }
  0x2c   : > { %1788 = vmatprep.subr.msk.bf16.mxu1 %vm509_vm0, %v447_v36  ;;  %v906_v17 = vpack.c.bf16 %v893_v14, %v892_v13  ;;  %v900_v23 = vld [vmem:[%s2426_s2 + $0x60] sm:$0xff]  ;;  %v901_v24 = vld [vmem:[%s2426_s2 + $0x68] sm:$0xff]  ;;  %v415_v27 = vld [vmem:[%s2050_s29 + $0x1d0] sm:$0xff]  ;;  %v595_v33 = vsel %vm509_vm0, %v441_v21, 0  ;;  %v434_v39 = vpack.c.bf16 %v384_v26, %v383_v25 }
  0x2d   : > { %v416_v29 = vld [vmem:[%s2050_s29 + $0x1d8] sm:$0xff]  ;;  %v898_v30 = vld [vmem:[%s2426_s2 + $0x50] sm:$0xff]  ;;  %934 = vperm.xlu0 %1835, %v908_v22   ;;  %v910_v36 = vpack.c.bf16 %v901_v24, %v900_v23  ;;  %v1210_v37 = vld [vmem:[%s2428_s4] sm:$0xff] }
  0x2e   : > { %924 = vperm.xlu1 %1836, %v906_v17   ;;  %v899_v31 = vld [vmem:[%s2426_s2 + $0x58] sm:$0xff]  ;;  %v367_v34 = vld [vmem:[%s2050_s29 + $0x50] sm:$0xff]  ;;  %v1211_v38 = vld [vmem:[%s2428_s4 + $0x8] sm:$0xff]  ;;  %v450_v44 = vpack.c.bf16 %v416_v29, %v415_v27 }
  0x2f   : > { %v368_v35 = vld [vmem:[%s2050_s29 + $0x58] sm:$0xff]  ;;  %v399_v40 = vld [vmem:[%s2050_s29 + $0x150] sm:$0xff]  ;;  %v909_v45 = vpack.c.bf16 %v899_v31, %v898_v30  ;;  %v1218_v46 = vpack.c.bf16 %v1211_v38, %v1210_v37  ;;  %v385_v51 = vld [vmem:[%s2050_s29 + $0xe0] sm:$0xff] }
  0x30   : > { %v400_v41 = vld [vmem:[%s2050_s29 + $0x158] sm:$0xff]  ;;  %v902_v42 = vld [vmem:[%s2426_s2 + $0x70] sm:$0xff]  ;;  %v386_v52 = vld [vmem:[%s2050_s29 + $0xe8] sm:$0xff] }
  0x31   : > { %v903_v43 = vld [vmem:[%s2426_s2 + $0x78] sm:$0xff]  ;;  %944 = vperm.xlu0 %1835, %v910_v36   ;;  %v417_v53 = vld [vmem:[%s2050_s29 + $0x1e0] sm:$0xff]  ;;  %v418_v55 = vld [vmem:[%s2050_s29 + $0x1e8] sm:$0xff]  ;;  %v435_v60 = vpack.c.bf16 %v386_v52, %v385_v51 }
  0x32   : > { %1719 = vmatpush3.bf16.xpose.msra.mxu0 %v541_v47  ;;  %929 = vperm.xlu1 %1836, %v907_v28   ;;  %v426_v47 = vpack.c.bf16 %v368_v35, %v367_v34  ;;  %v911_v54 = vpack.c.bf16 %v903_v43, %v902_v42  ;;  %v1212_v56 = vld [vmem:[%s2428_s4 + $0x10] sm:$0xff]  ;;  %v451_v62 = vpack.c.bf16 %v418_v55, %v417_v53  ;;  %v369_v63 = vld [vmem:[%s2050_s29 + $0x60] sm:$0xff]  ;;  %v370_v0 = vld [vmem:[%s2050_s29 + $0x68] sm:$0xff] }
  0x33   : > { %1751 = vmatpush3.bf16.xpose.msra.mxu1 %v589_v49  ;;  %1781 = vmatprep.subr.msk.bf16.mxu0 %vm509_vm0, %v432_v48  ;;  %v1214_v48 = vld [vmem:[%s2428_s4 + $0x20] sm:$0xff]  ;;  %v1215_v49 = vld [vmem:[%s2428_s4 + $0x28] sm:$0xff]  ;;  %v1219_v4 = vpack.c.bf16 %v1213_v57, %v1212_v56  ;;  %v1216_v6 = vld [vmem:[%s2428_s4 + $0x30] sm:$0xff]  ;;  %v427_v8 = vpack.c.bf16 %v370_v0, %v369_v63 }
  0x34   : > { %1789 = vmatprep.subr.msk.bf16.mxu1 %vm509_vm0, %v448_v50  ;;  %v442_v50 = vpack.c.bf16 %v400_v41, %v399_v40  ;;  %v1220_v58 = vpack.c.bf16 %v1215_v49, %v1214_v48  ;;  %v550_v59 = vsel %vm509_vm0, %v426_v47, 0  ;;  %v401_v3 = vld [vmem:[%s2050_s29 + $0x160] sm:$0xff]  ;;  %v402_v5 = vld [vmem:[%s2050_s29 + $0x168] sm:$0xff]  ;;  %v1217_v7 = vld [vmem:[%s2428_s4 + $0x38] sm:$0xff] }
  0x35   : > { %1224 = vperm.xlu0 %1835, %v1218_v46   ;;  %v1278_v9 = vld [vmem:[%s2430_s6] sm:$0xff]  ;;  %v388_v12 = vld [vmem:[%s2050_s29 + $0xf8] sm:$0xff]  ;;  %v1221_v13 = vpack.c.bf16 %v1217_v7, %v1216_v6  ;;  %v419_v14 = vld [vmem:[%s2050_s29 + $0x1f0] sm:$0xff] }
  0x36   : > { %939 = vperm.xlu1 %1836, %v909_v45   ;;  %v598_v61 = vsel %vm509_vm0, %v442_v50, 0  ;;  %v1280_v18 = vld [vmem:[%s2430_s6 + $0x10] sm:$0xff]  ;;  %v372_v22 = vld [vmem:[%s2050_s29 + $0x78] sm:$0xff]  ;;  %v1279_v25 = vld [vmem:[%s2430_s6 + $0x8] sm:$0xff] }
  0x37   : > { %v371_v21 = vld [vmem:[%s2050_s29 + $0x70] sm:$0xff]  ;;  %v404_v24 = vld [vmem:[%s2050_s29 + $0x178] sm:$0xff]  ;;  %v1441_v27 = vld [vmem:[%s2431_s7] sm:$0xff] }
  0x38   : > { %v403_v23 = vld [vmem:[%s2050_s29 + $0x170] sm:$0xff]  ;;  %v428_v26 = vpack.c.bf16 %v372_v22, %v371_v21  ;;  %v1281_v29 = vld [vmem:[%s2430_s6 + $0x18] sm:$0xff]  ;;  %v1517_v34 = vld [vmem:[#allocation2] sm:$0x1] }
  0x39   : > { %1234 = vperm.xlu0 %1835, %v1220_v58   ;;  %v444_v28 = vpack.c.bf16 %v404_v24, %v403_v23  ;;  %v1443_v31 = vld [vmem:[%s2431_s7 + $0x10] sm:$0xff]  ;;  %v1444_v35 = vld [vmem:[%s2431_s7 + $0x18] sm:$0xff]  ;;  %v1838_v36 = vld [vmem:[%s2425_s1 + $0x8] sm:$0xff]  }
  0x3a   : > { %1721 = vmatpush3.bf16.xpose.msra.mxu0 %v544_v10  ;;  %949 = vperm.xlu1 %1836, %v911_v54   ;;  %v443_v10 = vpack.c.bf16 %v402_v5, %v401_v3  ;;  %v556_v30 = vsel %vm509_vm0, %v428_v26, 0  ;;  %v1839_v37 = vld [vmem:[%s2425_s1 + $0x10] sm:$0xff]   ;;  %v1841_v38 = vld [vmem:[%s2425_s1 + $0x20] sm:$0xff]   ;;  %v1844_v41 = vld [vmem:[%s2425_s1 + $0x38] sm:$0xff]  }
  0x3b   : > { %1753 = vmatpush3.bf16.xpose.msra.mxu1 %v592_v15  ;;  %1782 = vmatprep.subr.msk.bf16.mxu0 %vm509_vm0, %v433_v11  ;;  %v387_v11 = vld [vmem:[%s2050_s29 + $0xf0] sm:$0xff]  ;;  %v420_v15 = vld [vmem:[%s2050_s29 + $0x1f8] sm:$0xff]  ;;  %s2382_s29 = scalar_lea.hbm %s2433_s9, %s2032_s22 }
  0x3c   : > { %1790 = vmatprep.subr.msk.bf16.mxu1 %vm509_vm0, %v449_v16  ;;  %v553_v16 = vsel %vm509_vm0, %v427_v8, 0  ;;  %v436_v17 = vpack.c.bf16 %v388_v12, %v387_v11  ;;  %v601_v19 = vsel %vm509_vm0, %v443_v10, 0  ;;  %v452_v20 = vpack.c.bf16 %v420_v15, %v419_v14  ;;  %v1843_v40 = vld [vmem:[%s2425_s1 + $0x30] sm:$0xff]  }
  0x3d   : > { %1284 = vperm.xlu0 %1835, %v1278_v9  }
  0x3e   : > { %1229 = vperm.xlu1 %1836, %v1219_v4  }
  0x41   : > { %1294 = vperm.xlu0 %1835, %v1280_v18  }
  0x42   : > { %1723 = vmatpush3.bf16.xpose.msra.mxu0 %v547_v32  ;;  %1239 = vperm.xlu1 %1836, %v1221_v13   ;;  %v604_v32 = vsel %vm509_vm0, %v444_v28, 0 }
  0x43   : > { %1755 = vmatpush3.bf16.xpose.msra.mxu1 %v595_v33  ;;  %1783 = vmatprep.subr.msk.bf16.mxu0 %vm509_vm0, %v434_v39  ;;  %v1442_v33 = vld [vmem:[%s2431_s7 + $0x8] sm:$0xff] }
  0x44   : > { %1791 = vmatprep.subr.msk.bf16.mxu1 %vm509_vm0, %v450_v44  ;;  %v1842_v39 = vld [vmem:[%s2425_s1 + $0x28] sm:$0xff]  }
  0x45   : > { %1447 = vperm.xlu0 %1835, %v1441_v27  }
  0x46   : > { %1289 = vperm.xlu1 %1836, %v1279_v25  }
  0x49   : > { %1457 = vperm.xlu0 %1835, %v1443_v31  }
  0x4a   : > { %1725 = vmatpush3.bf16.xpose.msra.mxu0 %v550_v59  ;;  %1299 = vperm.xlu1 %1836, %v1281_v29  }
  0x4b   : > { %1757 = vmatpush3.bf16.xpose.msra.mxu1 %v598_v61  ;;  %1784 = vmatprep.subr.msk.bf16.mxu0 %vm509_vm0, %v435_v60 }
  0x4c   : > { %1792 = vmatprep.subr.msk.bf16.mxu1 %vm509_vm0, %v451_v62 }
  0x4d   : > { %1520 = vperm.xlu0 %1835, %v1517_v34  }
  0x4e   : > { %1452 = vperm.xlu1 %1836, %v1442_v33  }
  0x52   : > { %1727 = vmatpush3.bf16.xpose.msra.mxu0 %v553_v16  ;;  %1462 = vperm.xlu1 %1836, %v1444_v35  }
  0x53   : > { %1759 = vmatpush3.bf16.xpose.msra.mxu1 %v601_v19  ;;  %1785 = vmatprep.subr.msk.bf16.mxu0 %vm509_vm0, %v436_v17 }
  0x54   : > { %1793 = vmatprep.subr.msk.bf16.mxu1 %vm509_vm0, %v452_v20 }
  0x5a   : > { %1729 = vmatpush3.bf16.xpose.msra.mxu0 %v556_v30 }
  0x5b   : > { %1761 = vmatpush3.bf16.xpose.msra.mxu1 %v604_v32 }
  0x61   : > { %1731 = vmatmul.mubr.msk.bf16.vlgmr.msra.gmra.mrb[0].mxu0 %vm509_vm0, %v2038_v1 }
  0x62   : > { %1763 = vmatmul.mubr.msk.bf16.vlgmr.msra.gmra.mrb[0].mxu1 %vm509_vm0, %v2038_v1  ;;  %1732 = vmatprep.mubr.msk.bf16.mxu0 %vm509_vm0, %v1838_v36  ;;  %v1840_v1 = vld [vmem:[%s2425_s1 + $0x18] sm:$0xff]  }
  0x63   : > { %1764 = vmatprep.mubr.msk.bf16.mxu1 %vm509_vm0, %v1838_v36 }
  0x69   : > { %1733 = vmatmul.mubr.msk.bf16.gmra.mrb[4].mxu0 %vm509_vm0, %v1838_v36 }
  0x6a   : > { %1765 = vmatmul.mubr.msk.bf16.gmra.mrb[4].mxu1 %vm509_vm0, %v1838_v36  ;;  %1734 = vmatprep.mubr.msk.bf16.mxu0 %vm509_vm0, %v1839_v37 }
  0x6b   : > { %1766 = vmatprep.mubr.msk.bf16.mxu1 %vm509_vm0, %v1839_v37 }
  0x71   : > { %1735 = vmatmul.mubr.msk.bf16.gmra.mrb[8].mxu0 %vm509_vm0, %v1839_v37 }
  0x72   : > { %1767 = vmatmul.mubr.msk.bf16.gmra.mrb[8].mxu1 %vm509_vm0, %v1839_v37  ;;  %1736 = vmatprep.mubr.msk.bf16.mxu0 %vm509_vm0, %v1840_v1 }
  0x73   : > { %1768 = vmatprep.mubr.msk.bf16.mxu1 %vm509_vm0, %v1840_v1 }
  0x79   : > { %1737 = vmatmul.mubr.msk.bf16.gmra.mrb[12].mxu0 %vm509_vm0, %v1840_v1 }
  0x7a   : > { %1769 = vmatmul.mubr.msk.bf16.gmra.mrb[12].mxu1 %vm509_vm0, %v1840_v1  ;;  %1738 = vmatprep.mubr.msk.bf16.mxu0 %vm509_vm0, %v1841_v38 }
  0x7b   : > { %1770 = vmatprep.mubr.msk.bf16.mxu1 %vm509_vm0, %v1841_v38 }
  0x81   : > { %1739 = vmatmul.mubr.msk.bf16.gmra.mrb[16].mxu0 %vm509_vm0, %v1841_v38 }
  0x82   : > { %1771 = vmatmul.mubr.msk.bf16.gmra.mrb[16].mxu1 %vm509_vm0, %v1841_v38  ;;  %1740 = vmatprep.mubr.msk.bf16.mxu0 %vm509_vm0, %v1842_v39 }
  0x83   : > { %1772 = vmatprep.mubr.msk.bf16.mxu1 %vm509_vm0, %v1842_v39 }
  0x89   : > { %1741 = vmatmul.mubr.msk.bf16.gmra.mrb[20].mxu0 %vm509_vm0, %v1842_v39 }
  0x8a   : > { %1773 = vmatmul.mubr.msk.bf16.gmra.mrb[20].mxu1 %vm509_vm0, %v1842_v39  ;;  %1742 = vmatprep.mubr.msk.bf16.mxu0 %vm509_vm0, %v1843_v40 }
  0x8b   : > { %1774 = vmatprep.mubr.msk.bf16.mxu1 %vm509_vm0, %v1843_v40 }
  0x91   : > { %1743 = vmatmul.mubr.msk.bf16.gmra.mrb[24].mxu0 %vm509_vm0, %v1843_v40 }
  0x92   : > { %1775 = vmatmul.mubr.msk.bf16.gmra.mrb[24].mxu1 %vm509_vm0, %v1843_v40  ;;  %1744 = vmatprep.mubr.msk.bf16.mxu0 %vm509_vm0, %v1844_v41 }
  0x93   : > { %1776 = vmatprep.mubr.msk.bf16.mxu1 %vm509_vm0, %v1844_v41  ;;  %v915_v50 = vpop.permute.xlu0 %914 }
  0x99   : > { %1745 = vmatmul.mubr.msk.bf16.gmra.mrb[28].mxu0 %vm509_vm0, %v1844_v41 }
  0x9a   : > { %1777 = vmatmul.mubr.msk.bf16.gmra.mrb[28].mxu1 %vm509_vm0, %v1844_v41  ;;  %1080 = vmatprep.mubr.bf16.mxu0 %v1931_v2 }
  0x9b   : > { %1153 = vmatprep.mubr.bf16.mxu1 %v1931_v2 }
  0xa0   : > { %v920_v9 = vpop.permute.xlu0 %919 }
  0xad   : > { %v925_v30 = vpop.permute.xlu1 %924 }
 0x134   : > { %v664_v42 = vpop.f32.mrb[0].mxu0 }
 0x135   : > { %v777_v43 = vpop.f32.mrb[0].mxu1  ;;  %v666_v44 = vpop.f32.mrb[1].mxu0 }
 0x136   : > { %v779_v45 = vpop.f32.mrb[1].mxu1  ;;  %v668_v46 = vpop.f32.mrb[2].mxu0 }
 0x137   : > { %v856_v47 = vpack.c.bf16 %v668_v46, %v664_v42  ;;  %v781_v48 = vpop.f32.mrb[2].mxu1  ;;  %v670_v49 = vpop.f32.mrb[3].mxu0 }
 0x138   : > { %v858_v51 = vpack.c.bf16 %v781_v48, %v777_v43  ;;  %v857_v52 = vpack.c.bf16 %v670_v49, %v666_v44  ;;  %v783_v53 = vpop.f32.mrb[3].mxu1 }
 0x139   : > { %v952_v54 = vadd.bf16 %v915_v50, %v856_v47  ;;  %v859_v55 = vpack.c.bf16 %v783_v53, %v779_v45 }
 0x13a   : > { %v954_v56 = vadd.bf16 %v915_v50, %v858_v51  ;;  %v953_v57 = vadd.bf16 %v915_v50, %v857_v52 }
 0x13b   : > { %v955_v58 = vadd.bf16 %v915_v50, %v859_v55  ;;  %v984_v61 = vmax.bf16 %v1931_v2, %v952_v54  ;;  %v930_v50 = vpop.permute.xlu1 %929 }
 0x13c   : > { %v674_v59 = vpop.f32.mrb[4].mxu0  ;;  %v985_v60 = vmax.bf16 %v1931_v2, %v953_v57  ;;  %v986_v3 = vmax.bf16 %v1931_v2, %v954_v56 }
 0x13d   : > { %v787_v62 = vpop.f32.mrb[4].mxu1  ;;  %v676_v63 = vpop.f32.mrb[5].mxu0  ;;  %v987_v0 = vmax.bf16 %v1931_v2, %v955_v58 }
 0x13e   : > { %v789_v4 = vpop.f32.mrb[5].mxu1  ;;  %v678_v5 = vpop.f32.mrb[6].mxu0  ;;  %1048 = vmatprep.subr.bf16.mxu0 %v985_v60 }
 0x13f   : > { %v860_v6 = vpack.c.bf16 %v678_v5, %v674_v59  ;;  %v791_v7 = vpop.f32.mrb[6].mxu1  ;;  %1121 = vmatprep.subr.bf16.mxu1 %v987_v0  ;;  %v680_v8 = vpop.f32.mrb[7].mxu0  ;;  %1049 = vmatpush1.bf16.msra.mxu0 %v984_v61 }
 0x140   : > { %v862_v10 = vpack.c.bf16 %v791_v7, %v787_v62  ;;  %v861_v11 = vpack.c.bf16 %v680_v8, %v676_v63  ;;  %v793_v12 = vpop.f32.mrb[7].mxu1  ;;  %1122 = vmatpush1.bf16.msra.mxu1 %v986_v3 }
 0x141   : > { %v956_v13 = vadd.bf16 %v920_v9, %v860_v6  ;;  %v863_v14 = vpack.c.bf16 %v793_v12, %v789_v4 }
 0x142   : > { %v958_v15 = vadd.bf16 %v920_v9, %v862_v10  ;;  %v957_v16 = vadd.bf16 %v920_v9, %v861_v11 }
 0x143   : > { %v959_v17 = vadd.bf16 %v920_v9, %v863_v14  ;;  %v988_v20 = vmax.bf16 %v1931_v2, %v956_v13  ;;  %v935_v9 = vpop.permute.xlu0 %934 }
 0x144   : > { %v684_v18 = vpop.f32.mrb[8].mxu0  ;;  %v989_v19 = vmax.bf16 %v1931_v2, %v957_v16  ;;  %v990_v24 = vmax.bf16 %v1931_v2, %v958_v15 }
 0x145   : > { %v797_v21 = vpop.f32.mrb[8].mxu1  ;;  %v686_v22 = vpop.f32.mrb[9].mxu0  ;;  %v991_v23 = vmax.bf16 %v1931_v2, %v959_v17 }
 0x146   : > { %v799_v25 = vpop.f32.mrb[9].mxu1  ;;  %v688_v26 = vpop.f32.mrb[10].mxu0  ;;  %1050 = vmatprep.subr.bf16.mxu0 %v989_v19 }
 0x147   : > { %v864_v27 = vpack.c.bf16 %v688_v26, %v684_v18  ;;  %v801_v28 = vpop.f32.mrb[10].mxu1  ;;  %1123 = vmatprep.subr.bf16.mxu1 %v991_v23  ;;  %v690_v29 = vpop.f32.mrb[11].mxu0  ;;  %1051 = vmatpush1.bf16.msra.mxu0 %v988_v20 }
 0x148   : > { %v866_v31 = vpack.c.bf16 %v801_v28, %v797_v21  ;;  %v865_v32 = vpack.c.bf16 %v690_v29, %v686_v22  ;;  %v803_v33 = vpop.f32.mrb[11].mxu1  ;;  %1124 = vmatpush1.bf16.msra.mxu1 %v990_v24 }
 0x149   : > { %v960_v34 = vadd.bf16 %v925_v30, %v864_v27  ;;  %v867_v35 = vpack.c.bf16 %v803_v33, %v799_v25 }
 0x14a   : > { %v962_v36 = vadd.bf16 %v925_v30, %v866_v31  ;;  %v961_v37 = vadd.bf16 %v925_v30, %v865_v32 }
 0x14b   : > { %v963_v1 = vadd.bf16 %v925_v30, %v867_v35  ;;  %v992_v40 = vmax.bf16 %v1931_v2, %v960_v34  ;;  %v940_v30 = vpop.permute.xlu1 %939 }
 0x14c   : > { %v694_v38 = vpop.f32.mrb[12].mxu0  ;;  %v993_v39 = vmax.bf16 %v1931_v2, %v961_v37  ;;  %v994_v44 = vmax.bf16 %v1931_v2, %v962_v36 }
 0x14d   : > { %v807_v41 = vpop.f32.mrb[12].mxu1  ;;  %v696_v42 = vpop.f32.mrb[13].mxu0  ;;  %v995_v43 = vmax.bf16 %v1931_v2, %v963_v1 }
 0x14e   : > { %v809_v45 = vpop.f32.mrb[13].mxu1  ;;  %v698_v46 = vpop.f32.mrb[14].mxu0  ;;  %1052 = vmatprep.subr.bf16.mxu0 %v993_v39 }
 0x14f   : > { %v868_v47 = vpack.c.bf16 %v698_v46, %v694_v38  ;;  %v811_v48 = vpop.f32.mrb[14].mxu1  ;;  %1125 = vmatprep.subr.bf16.mxu1 %v995_v43  ;;  %v700_v49 = vpop.f32.mrb[15].mxu0  ;;  %1053 = vmatpush1.bf16.msra.mxu0 %v992_v40 }
 0x150   : > { %v870_v51 = vpack.c.bf16 %v811_v48, %v807_v41  ;;  %v869_v52 = vpack.c.bf16 %v700_v49, %v696_v42  ;;  %v813_v53 = vpop.f32.mrb[15].mxu1  ;;  %1126 = vmatpush1.bf16.msra.mxu1 %v994_v44 }
 0x151   : > { %v964_v54 = vadd.bf16 %v930_v50, %v868_v47  ;;  %v871_v55 = vpack.c.bf16 %v813_v53, %v809_v45 }
 0x152   : > { %v966_v56 = vadd.bf16 %v930_v50, %v870_v51  ;;  %v965_v57 = vadd.bf16 %v930_v50, %v869_v52 }
 0x153   : > { %v967_v58 = vadd.bf16 %v930_v50, %v871_v55  ;;  %v996_v61 = vmax.bf16 %v1931_v2, %v964_v54  ;;  %v945_v50 = vpop.permute.xlu0 %944 }
 0x154   : > { %v704_v59 = vpop.f32.mrb[16].mxu0  ;;  %v997_v60 = vmax.bf16 %v1931_v2, %v965_v57  ;;  %v998_v3 = vmax.bf16 %v1931_v2, %v966_v56 }
 0x155   : > { %v817_v62 = vpop.f32.mrb[16].mxu1  ;;  %v706_v63 = vpop.f32.mrb[17].mxu0  ;;  %v999_v0 = vmax.bf16 %v1931_v2, %v967_v58 }
 0x156   : > { %v819_v4 = vpop.f32.mrb[17].mxu1  ;;  %v708_v5 = vpop.f32.mrb[18].mxu0  ;;  %1054 = vmatprep.subr.bf16.mxu0 %v997_v60 }
 0x157   : > { %v872_v6 = vpack.c.bf16 %v708_v5, %v704_v59  ;;  %v821_v7 = vpop.f32.mrb[18].mxu1  ;;  %1127 = vmatprep.subr.bf16.mxu1 %v999_v0  ;;  %v710_v8 = vpop.f32.mrb[19].mxu0  ;;  %1055 = vmatpush1.bf16.msra.mxu0 %v996_v61 }
 0x158   : > { %v874_v10 = vpack.c.bf16 %v821_v7, %v817_v62  ;;  %v873_v11 = vpack.c.bf16 %v710_v8, %v706_v63  ;;  %v823_v12 = vpop.f32.mrb[19].mxu1  ;;  %1128 = vmatpush1.bf16.msra.mxu1 %v998_v3 }
 0x159   : > { %v968_v13 = vadd.bf16 %v935_v9, %v872_v6  ;;  %v875_v14 = vpack.c.bf16 %v823_v12, %v819_v4 }
 0x15a   : > { %v970_v15 = vadd.bf16 %v935_v9, %v874_v10  ;;  %v969_v16 = vadd.bf16 %v935_v9, %v873_v11 }
 0x15b   : > { %v971_v17 = vadd.bf16 %v935_v9, %v875_v14  ;;  %v1000_v20 = vmax.bf16 %v1931_v2, %v968_v13  ;;  %v950_v9 = vpop.permute.xlu1 %949 }
 0x15c   : > { %v714_v18 = vpop.f32.mrb[20].mxu0  ;;  %v1001_v19 = vmax.bf16 %v1931_v2, %v969_v16  ;;  %v1002_v24 = vmax.bf16 %v1931_v2, %v970_v15 }
 0x15d   : > { %v827_v21 = vpop.f32.mrb[20].mxu1  ;;  %v716_v22 = vpop.f32.mrb[21].mxu0  ;;  %v1003_v23 = vmax.bf16 %v1931_v2, %v971_v17 }
 0x15e   : > { %v829_v25 = vpop.f32.mrb[21].mxu1  ;;  %v718_v26 = vpop.f32.mrb[22].mxu0  ;;  %1056 = vmatprep.subr.bf16.mxu0 %v1001_v19 }
 0x15f   : > { %v876_v27 = vpack.c.bf16 %v718_v26, %v714_v18  ;;  %v831_v28 = vpop.f32.mrb[22].mxu1  ;;  %1129 = vmatprep.subr.bf16.mxu1 %v1003_v23  ;;  %v720_v29 = vpop.f32.mrb[23].mxu0  ;;  %1057 = vmatpush1.bf16.msra.mxu0 %v1000_v20  ;;  %v1846_v23 = vld [vmem:[%s2427_s3 + $0x8] sm:$0xff]  }
 0x160   : > { %v878_v31 = vpack.c.bf16 %v831_v28, %v827_v21  ;;  %v877_v32 = vpack.c.bf16 %v720_v29, %v716_v22  ;;  %v833_v33 = vpop.f32.mrb[23].mxu1  ;;  %1130 = vmatpush1.bf16.msra.mxu1 %v1002_v24  ;;  %v1845_v22 = vld [vmem:[%s2427_s3] sm:$0xff]   ;;  %v1847_v24 = vld [vmem:[%s2427_s3 + $0x10] sm:$0xff]  }
 0x161   : > { %v972_v34 = vadd.bf16 %v940_v30, %v876_v27  ;;  %v879_v35 = vpack.c.bf16 %v833_v33, %v829_v25  ;;  %v1848_v25 = vld [vmem:[%s2427_s3 + $0x18] sm:$0xff]  }
 0x162   : > { %v974_v36 = vadd.bf16 %v940_v30, %v878_v31  ;;  %v973_v37 = vadd.bf16 %v940_v30, %v877_v32 }
 0x163   : > { %v975_v1 = vadd.bf16 %v940_v30, %v879_v35  ;;  %v1004_v40 = vmax.bf16 %v1931_v2, %v972_v34  ;;  %v1225_v34 = vpop.permute.xlu0 %1224 }
 0x164   : > { %v724_v38 = vpop.f32.mrb[24].mxu0  ;;  %v1005_v39 = vmax.bf16 %v1931_v2, %v973_v37  ;;  %v1006_v44 = vmax.bf16 %v1931_v2, %v974_v36 }
 0x165   : > { %v837_v41 = vpop.f32.mrb[24].mxu1  ;;  %v726_v42 = vpop.f32.mrb[25].mxu0  ;;  %v1007_v43 = vmax.bf16 %v1931_v2, %v975_v1 }
 0x166   : > { %v839_v45 = vpop.f32.mrb[25].mxu1  ;;  %v728_v46 = vpop.f32.mrb[26].mxu0  ;;  %1058 = vmatprep.subr.bf16.mxu0 %v1005_v39 }
 0x167   : > { %v880_v47 = vpack.c.bf16 %v728_v46, %v724_v38  ;;  %v841_v48 = vpop.f32.mrb[26].mxu1  ;;  %1131 = vmatprep.subr.bf16.mxu1 %v1007_v43  ;;  %v730_v49 = vpop.f32.mrb[27].mxu0  ;;  %1059 = vmatpush1.bf16.msra.mxu0 %v1004_v40 }
 0x168   : > { %v882_v51 = vpack.c.bf16 %v841_v48, %v837_v41  ;;  %v881_v52 = vpack.c.bf16 %v730_v49, %v726_v42  ;;  %v843_v53 = vpop.f32.mrb[27].mxu1  ;;  %1132 = vmatpush1.bf16.msra.mxu1 %v1006_v44 }
 0x169   : > { %v976_v54 = vadd.bf16 %v945_v50, %v880_v47  ;;  %v883_v55 = vpack.c.bf16 %v843_v53, %v839_v45 }
 0x16a   : > { %v978_v56 = vadd.bf16 %v945_v50, %v882_v51  ;;  %v977_v57 = vadd.bf16 %v945_v50, %v881_v52 }
 0x16b   : > { %v979_v58 = vadd.bf16 %v945_v50, %v883_v55  ;;  %v1008_v61 = vmax.bf16 %v1931_v2, %v976_v54  ;;  %v1230_v54 = vpop.permute.xlu1 %1229 }
 0x16c   : > { %v734_v59 = vpop.f32.mrb[28].mxu0  ;;  %v1009_v60 = vmax.bf16 %v1931_v2, %v977_v57  ;;  %v1010_v3 = vmax.bf16 %v1931_v2, %v978_v56 }
 0x16d   : > { %v847_v62 = vpop.f32.mrb[28].mxu1  ;;  %v736_v63 = vpop.f32.mrb[29].mxu0  ;;  %v1011_v0 = vmax.bf16 %v1931_v2, %v979_v58 }
 0x16e   : > { %v849_v4 = vpop.f32.mrb[29].mxu1  ;;  %v738_v5 = vpop.f32.mrb[30].mxu0  ;;  %1060 = vmatprep.subr.bf16.mxu0 %v1009_v60 }
 0x16f   : > { %v884_v6 = vpack.c.bf16 %v738_v5, %v734_v59  ;;  %v851_v7 = vpop.f32.mrb[30].mxu1  ;;  %1133 = vmatprep.subr.bf16.mxu1 %v1011_v0  ;;  %v740_v8 = vpop.f32.mrb[31].mxu0  ;;  %1061 = vmatpush1.bf16.msra.mxu0 %v1008_v61 }
 0x170   : > { %v886_v10 = vpack.c.bf16 %v851_v7, %v847_v62  ;;  %v885_v11 = vpack.c.bf16 %v740_v8, %v736_v63  ;;  %v853_v12 = vpop.f32.mrb[31].mxu1  ;;  %1134 = vmatpush1.bf16.msra.mxu1 %v1010_v3 }
 0x171   : > { %v980_v13 = vadd.bf16 %v950_v9, %v884_v6  ;;  %v887_v14 = vpack.c.bf16 %v853_v12, %v849_v4 }
 0x172   : > { %v982_v15 = vadd.bf16 %v950_v9, %v886_v10  ;;  %v981_v16 = vadd.bf16 %v950_v9, %v885_v11 }
 0x173   : > { %v983_v17 = vadd.bf16 %v950_v9, %v887_v14  ;;  %v1012_v19 = vmax.bf16 %v1931_v2, %v980_v13  ;;  %v1235_v13 = vpop.permute.xlu0 %1234 }
 0x174   : > { %v1013_v18 = vmax.bf16 %v1931_v2, %v981_v16  ;;  %v1014_v21 = vmax.bf16 %v1931_v2, %v982_v15 }
 0x175   : > { %v1015_v20 = vmax.bf16 %v1931_v2, %v983_v17 }
 0x176   : > { %1062 = vmatprep.subr.bf16.mxu0 %v1013_v18 }
 0x177   : > { %1135 = vmatprep.subr.bf16.mxu1 %v1015_v20  ;;  %1063 = vmatpush1.bf16.msra.mxu0 %v1012_v19 }
 0x178   : > { %1136 = vmatpush1.bf16.msra.mxu1 %v1014_v21 }
 0x17a   : > { %1081 = vmatmul.mubr.bf16.vlgmr.msra.gmra.mrb[32].mxu0 %v1845_v22 }
 0x17b   : > { %1154 = vmatmul.mubr.bf16.vlgmr.msra.gmra.mrb[32].mxu1 %v1845_v22  ;;  %1090 = vmatprep.mubr.bf16.mxu0 %v1931_v2 }
 0x17c   : > { %1163 = vmatprep.mubr.bf16.mxu1 %v1931_v2 }
 0x182   : > { %1091 = vmatmul.mubr.bf16.gmra.mrb[36].mxu0 %v1846_v23 }
 0x183   : > { %1164 = vmatmul.mubr.bf16.gmra.mrb[36].mxu1 %v1846_v23  ;;  %1100 = vmatprep.mubr.bf16.mxu0 %v1931_v2 }
 0x184   : > { %1173 = vmatprep.mubr.bf16.mxu1 %v1931_v2 }
 0x18a   : > { %1101 = vmatmul.mubr.bf16.gmra.mrb[40].mxu0 %v1847_v24 }
 0x18b   : > { %1174 = vmatmul.mubr.bf16.gmra.mrb[40].mxu1 %v1847_v24  ;;  %1110 = vmatprep.mubr.bf16.mxu0 %v1931_v2 }
 0x18c   : > { %1183 = vmatprep.mubr.bf16.mxu1 %v1931_v2 }
 0x192   : > { %1111 = vmatmul.mubr.bf16.gmra.mrb[44].mxu0 %v1848_v25 }
 0x193   : > { %1184 = vmatmul.mubr.bf16.gmra.mrb[44].mxu1 %v1848_v25  ;;  %1351 = vmatprep.mubr.bf16.mxu0 %v1931_v2 }
 0x194   : > { %1404 = vmatprep.mubr.bf16.mxu1 %v1931_v2 }
 0x24d   : > { %v1082_v26 = vpop.f32.mrb[32].mxu0 }
 0x24e   : > { %v1155_v27 = vpop.f32.mrb[32].mxu1  ;;  %v1084_v28 = vpop.f32.mrb[33].mxu0 }
 0x24f   : > { %v1157_v29 = vpop.f32.mrb[33].mxu1  ;;  %v1086_v30 = vpop.f32.mrb[34].mxu0 }
 0x250   : > { %v1194_v31 = vpack.c.bf16 %v1086_v30, %v1082_v26  ;;  %v1159_v32 = vpop.f32.mrb[34].mxu1  ;;  %v1088_v33 = vpop.f32.mrb[35].mxu0 }
 0x251   : > { %v1196_v35 = vpack.c.bf16 %v1159_v32, %v1155_v27  ;;  %v1195_v36 = vpack.c.bf16 %v1088_v33, %v1084_v28  ;;  %v1161_v37 = vpop.f32.mrb[35].mxu1 }
 0x252   : > { %v1242_v1 = vadd.bf16 %v1225_v34, %v1194_v31  ;;  %v1197_v38 = vpack.c.bf16 %v1161_v37, %v1157_v29 }
 0x253   : > { %v1244_v39 = vadd.bf16 %v1225_v34, %v1196_v35  ;;  %v1243_v40 = vadd.bf16 %v1225_v34, %v1195_v36 }
 0x254   : > { %v1245_v41 = vadd.bf16 %v1225_v34, %v1197_v38  ;;  %v1258_v44 = vmax.bf16 %v1931_v2, %v1242_v1  ;;  %v1240_v34 = vpop.permute.xlu1 %1239 }
 0x255   : > { %v1092_v42 = vpop.f32.mrb[36].mxu0  ;;  %v1259_v43 = vmax.bf16 %v1931_v2, %v1243_v40  ;;  %v1260_v48 = vmax.bf16 %v1931_v2, %v1244_v39 }
 0x256   : > { %v1165_v45 = vpop.f32.mrb[36].mxu1  ;;  %v1094_v46 = vpop.f32.mrb[37].mxu0  ;;  %v1261_v47 = vmax.bf16 %v1931_v2, %v1245_v41 }
 0x257   : > { %v1167_v49 = vpop.f32.mrb[37].mxu1  ;;  %v1096_v50 = vpop.f32.mrb[38].mxu0  ;;  %1319 = vmatprep.subr.bf16.mxu0 %v1259_v43 }
 0x258   : > { %v1198_v51 = vpack.c.bf16 %v1096_v50, %v1092_v42  ;;  %v1169_v52 = vpop.f32.mrb[38].mxu1  ;;  %1372 = vmatprep.subr.bf16.mxu1 %v1261_v47  ;;  %v1098_v53 = vpop.f32.mrb[39].mxu0  ;;  %1320 = vmatpush1.bf16.msra.mxu0 %v1258_v44  ;;  %v1850_v47 = vld [vmem:[%s2429_s5 + $0x8] sm:$0xff]  }
 0x259   : > { %v1200_v55 = vpack.c.bf16 %v1169_v52, %v1165_v45  ;;  %v1199_v56 = vpack.c.bf16 %v1098_v53, %v1094_v46  ;;  %v1171_v57 = vpop.f32.mrb[39].mxu1  ;;  %1373 = vmatpush1.bf16.msra.mxu1 %v1260_v48  ;;  %v1849_v46 = vld [vmem:[%s2429_s5] sm:$0xff]   ;;  %v1285_v48 = vpop.permute.xlu0 %1284 }
 0x25a   : > { %v1246_v58 = vadd.bf16 %v1230_v54, %v1198_v51  ;;  %v1201_v59 = vpack.c.bf16 %v1171_v57, %v1167_v49  ;;  %v1290_v49 = vpop.permute.xlu1 %1289 }
 0x25b   : > { %v1248_v60 = vadd.bf16 %v1230_v54, %v1200_v55  ;;  %v1247_v61 = vadd.bf16 %v1230_v54, %v1199_v56 }
 0x25c   : > { %v1249_v62 = vadd.bf16 %v1230_v54, %v1201_v59  ;;  %v1262_v3 = vmax.bf16 %v1931_v2, %v1246_v58 }
 0x25d   : > { %v1102_v63 = vpop.f32.mrb[40].mxu0  ;;  %v1263_v0 = vmax.bf16 %v1931_v2, %v1247_v61  ;;  %v1264_v7 = vmax.bf16 %v1931_v2, %v1248_v60  ;;  %v1295_v50 = vpop.permute.xlu0 %1294 }
 0x25e   : > { %v1175_v4 = vpop.f32.mrb[40].mxu1  ;;  %v1104_v5 = vpop.f32.mrb[41].mxu0  ;;  %v1265_v6 = vmax.bf16 %v1931_v2, %v1249_v62 }
 0x25f   : > { %v1177_v8 = vpop.f32.mrb[41].mxu1  ;;  %v1106_v9 = vpop.f32.mrb[42].mxu0  ;;  %1321 = vmatprep.subr.bf16.mxu0 %v1263_v0 }
 0x260   : > { %v1202_v10 = vpack.c.bf16 %v1106_v9, %v1102_v63  ;;  %v1179_v11 = vpop.f32.mrb[42].mxu1  ;;  %1374 = vmatprep.subr.bf16.mxu1 %v1265_v6  ;;  %v1108_v12 = vpop.f32.mrb[43].mxu0  ;;  %1322 = vmatpush1.bf16.msra.mxu0 %v1262_v3 }
 0x261   : > { %v1204_v14 = vpack.c.bf16 %v1179_v11, %v1175_v4  ;;  %v1203_v15 = vpack.c.bf16 %v1108_v12, %v1104_v5  ;;  %v1181_v16 = vpop.f32.mrb[43].mxu1  ;;  %1375 = vmatpush1.bf16.msra.mxu1 %v1264_v7  ;;  %v1300_v51 = vpop.permute.xlu1 %1299 }
 0x262   : > { %v1250_v17 = vadd.bf16 %v1235_v13, %v1202_v10  ;;  %v1205_v18 = vpack.c.bf16 %v1181_v16, %v1177_v8  ;;  %v1448_v10 = vpop.permute.xlu0 %1447 }
 0x263   : > { %v1252_v19 = vadd.bf16 %v1235_v13, %v1204_v14  ;;  %v1251_v20 = vadd.bf16 %v1235_v13, %v1203_v15 }
 0x264   : > { %v1253_v21 = vadd.bf16 %v1235_v13, %v1205_v18  ;;  %v1266_v24 = vmax.bf16 %v1931_v2, %v1250_v17 }
 0x265   : > { %v1112_v22 = vpop.f32.mrb[44].mxu0  ;;  %v1267_v23 = vmax.bf16 %v1931_v2, %v1251_v20  ;;  %v1268_v28 = vmax.bf16 %v1931_v2, %v1252_v19  ;;  %v1453_v11 = vpop.permute.xlu1 %1452 }
 0x266   : > { %v1185_v25 = vpop.f32.mrb[44].mxu1  ;;  %v1114_v26 = vpop.f32.mrb[45].mxu0  ;;  %v1269_v27 = vmax.bf16 %v1931_v2, %v1253_v21 }
 0x267   : > { %v1187_v29 = vpop.f32.mrb[45].mxu1  ;;  %v1116_v30 = vpop.f32.mrb[46].mxu0  ;;  %1323 = vmatprep.subr.bf16.mxu0 %v1267_v23 }
 0x268   : > { %v1206_v31 = vpack.c.bf16 %v1116_v30, %v1112_v22  ;;  %v1189_v32 = vpop.f32.mrb[46].mxu1  ;;  %1376 = vmatprep.subr.bf16.mxu1 %v1269_v27  ;;  %v1118_v33 = vpop.f32.mrb[47].mxu0  ;;  %1324 = vmatpush1.bf16.msra.mxu0 %v1266_v24 }
 0x269   : > { %v1208_v35 = vpack.c.bf16 %v1189_v32, %v1185_v25  ;;  %v1207_v36 = vpack.c.bf16 %v1118_v33, %v1114_v26  ;;  %v1191_v37 = vpop.f32.mrb[47].mxu1  ;;  %1377 = vmatpush1.bf16.msra.mxu1 %v1268_v28 }
 0x26a   : > { %v1254_v1 = vadd.bf16 %v1240_v34, %v1206_v31  ;;  %v1209_v38 = vpack.c.bf16 %v1191_v37, %v1187_v29 }
 0x26b   : > { %v1256_v39 = vadd.bf16 %v1240_v34, %v1208_v35  ;;  %v1255_v40 = vadd.bf16 %v1240_v34, %v1207_v36 }
 0x26c   : > { %v1257_v41 = vadd.bf16 %v1240_v34, %v1209_v38  ;;  %v1270_v43 = vmax.bf16 %v1931_v2, %v1254_v1 }
 0x26d   : > { %v1271_v42 = vmax.bf16 %v1931_v2, %v1255_v40  ;;  %v1272_v45 = vmax.bf16 %v1931_v2, %v1256_v39  ;;  %v1458_v39 = vpop.permute.xlu0 %1457 }
 0x26e   : > { %v1273_v44 = vmax.bf16 %v1931_v2, %v1257_v41 }
 0x26f   : > { %1325 = vmatprep.subr.bf16.mxu0 %v1271_v42 }
 0x270   : > { %1378 = vmatprep.subr.bf16.mxu1 %v1273_v44  ;;  %1326 = vmatpush1.bf16.msra.mxu0 %v1270_v43 }
 0x271   : > { %1379 = vmatpush1.bf16.msra.mxu1 %v1272_v45 }
 0x273   : > { %1700 = vmatmul.mubr.msk.bf16.vlgmr.msra.gmra.mrb[48].mxu0 %vm1312_vm1, %v1849_v46 }
 0x274   : > { %1702 = vmatmul.mubr.msk.bf16.vlgmr.msra.gmra.mrb[48].mxu1 %vm1312_vm1, %v1849_v46  ;;  %1361 = vmatprep.mubr.bf16.mxu0 %v1931_v2 }
 0x275   : > { %1414 = vmatprep.mubr.bf16.mxu1 %v1931_v2 }
 0x27b   : > { %1701 = vmatmul.mubr.msk.bf16.gmra.mrb[52].mxu0 %vm1312_vm1, %v1850_v47 }
 0x27c   : > { %1703 = vmatmul.mubr.msk.bf16.gmra.mrb[52].mxu1 %vm1312_vm1, %v1850_v47 }
 0x346   : > { %v1353_v52 = vpop.f32.mrb[48].mxu0 }
 0x347   : > { %v1354_v53 = vadd.f32 %v1353_v52, %v1285_v48  ;;  %v1406_v54 = vpop.f32.mrb[48].mxu1  ;;  %v1355_v55 = vpop.f32.mrb[49].mxu0 }
 0x348   : > { %v1407_v56 = vadd.f32 %v1406_v54, %v1285_v48  ;;  %v1356_v57 = vadd.f32 %v1355_v55, %v1285_v48  ;;  %v1408_v58 = vpop.f32.mrb[49].mxu1  ;;  %v1357_v59 = vpop.f32.mrb[50].mxu0 }
 0x349   : > { %v1425_v60 = vmax.f32 %v1354_v53, 0.0  ;;  %v1409_v2 = vadd.f32 %v1408_v58, %v1285_v48  ;;  %v1358_v61 = vadd.f32 %v1357_v59, %v1290_v49  ;;  %v1410_v62 = vpop.f32.mrb[50].mxu1  ;;  %v1359_v63 = vpop.f32.mrb[51].mxu0 }
 0x34a   : > { %v1427_v0 = vmax.f32 %v1407_v56, 0.0  ;;  %v1426_v3 = vmax.f32 %v1356_v57, 0.0  ;;  %v1411_v4 = vadd.f32 %v1410_v62, %v1290_v49  ;;  %v1360_v5 = vadd.f32 %v1359_v63, %v1290_v49  ;;  %v1412_v6 = vpop.f32.mrb[51].mxu1 }
 0x34b   : > { %v1428_v7 = vmax.f32 %v1409_v2, 0.0  ;;  %v1429_v8 = vmax.f32 %v1358_v61, 0.0  ;;  %v1413_v9 = vadd.f32 %v1412_v6, %v1290_v49  ;;  %v1465_v14 = vmul.f32 %v1448_v10, %v1425_v60  ;;  %v1463_v49 = vpop.permute.xlu1 %1462 }
 0x34c   : > { %v1431_v12 = vmax.f32 %v1411_v4, 0.0  ;;  %v1430_v13 = vmax.f32 %v1360_v5, 0.0  ;;  %v1467_v17 = vmul.f32 %v1448_v10, %v1427_v0  ;;  %v1466_v18 = vmul.f32 %v1448_v10, %v1426_v3 }
 0x34d   : > { %v1469_v15 = vmul.f32 %v1453_v11, %v1429_v8  ;;  %v1432_v16 = vmax.f32 %v1413_v9, 0.0  ;;  %v1468_v22 = vmul.f32 %v1448_v10, %v1428_v7  ;;  %v1523_v62 = vlaneseq }
 0x34e   : > { %v1471_v19 = vmul.f32 %v1453_v11, %v1431_v12  ;;  %v1470_v20 = vmul.f32 %v1453_v11, %v1430_v13  ;;  %v1363_v21 = vpop.f32.mrb[52].mxu0 }
 0x34f   : > { %v1481_v23 = vadd.f32 %v1469_v15, %v1465_v14  ;;  %v1472_v24 = vmul.f32 %v1453_v11, %v1432_v16  ;;  %v1364_v25 = vadd.f32 %v1363_v21, %v1295_v50  ;;  %v1416_v26 = vpop.f32.mrb[52].mxu1  ;;  %v1365_v27 = vpop.f32.mrb[53].mxu0  ;;  %v1524_v9 = vshrl.u32 %v1523_v62, 7 }
 0x350   : > { %v1499_v28 = vadd.f32 %v1471_v19, %v1467_v17  ;;  %v1490_v29 = vadd.f32 %v1470_v20, %v1466_v18  ;;  %v1417_v30 = vadd.f32 %v1416_v26, %v1295_v50  ;;  %v1366_v31 = vadd.f32 %v1365_v27, %v1295_v50  ;;  %v1418_v32 = vpop.f32.mrb[53].mxu1  ;;  %v1367_v33 = vpop.f32.mrb[54].mxu0 }
 0x351   : > { %v1508_v34 = vadd.f32 %v1472_v24, %v1468_v22  ;;  %v1433_v35 = vmax.f32 %v1364_v25, 0.0  ;;  %v1419_v36 = vadd.f32 %v1418_v32, %v1295_v50  ;;  %v1368_v37 = vadd.f32 %v1367_v33, %v1300_v51  ;;  %v1420_v1 = vpop.f32.mrb[54].mxu1  ;;  %v1369_v38 = vpop.f32.mrb[55].mxu0 }
 0x352   : > { %v1435_v40 = vmax.f32 %v1417_v30, 0.0  ;;  %v1434_v41 = vmax.f32 %v1366_v31, 0.0  ;;  %v1421_v42 = vadd.f32 %v1420_v1, %v1300_v51  ;;  %v1370_v43 = vadd.f32 %v1369_v38, %v1300_v51  ;;  %v1422_v44 = vpop.f32.mrb[55].mxu1  ;;  %v1521_v21 = vpop.permute.xlu0 %1520 }
 0x353   : > { %v1473_v45 = vmul.f32 %v1458_v39, %v1433_v35  ;;  %v1436_v46 = vmax.f32 %v1419_v36, 0.0  ;;  %v1437_v47 = vmax.f32 %v1368_v37, 0.0  ;;  %v1423_v48 = vadd.f32 %v1422_v44, %v1300_v51 }
 0x354   : > { %v1475_v52 = vmul.f32 %v1458_v39, %v1435_v40  ;;  %v1474_v53 = vmul.f32 %v1458_v39, %v1434_v41  ;;  %v1439_v54 = vmax.f32 %v1421_v42, 0.0  ;;  %v1438_v55 = vmax.f32 %v1370_v43, 0.0 }
 0x355   : > { %v1482_v56 = vadd.f32 %v1481_v23, %v1473_v45  ;;  %v1476_v50 = vmul.f32 %v1458_v39, %v1436_v46  ;;  %v1477_v57 = vmul.f32 %v1463_v49, %v1437_v47  ;;  %v1440_v58 = vmax.f32 %v1423_v48, 0.0 }
 0x356   : > { %v1500_v59 = vadd.f32 %v1499_v28, %v1475_v52  ;;  %v1491_v60 = vadd.f32 %v1490_v29, %v1474_v53  ;;  %v1479_v2 = vmul.f32 %v1463_v49, %v1439_v54  ;;  %v1478_v61 = vmul.f32 %v1463_v49, %v1438_v55 }
 0x357   : > { %v1509_v63 = vadd.f32 %v1508_v34, %v1476_v50  ;;  %v1483_v0 = vadd.f32 %v1482_v56, %v1477_v57  ;;  %v1480_v3 = vmul.f32 %v1463_v49, %v1440_v58  ;;  %v1525_v18 = vsub.s32 0, %v1524_v9 }
 0x358   : > { %v1501_v4 = vadd.f32 %v1500_v59, %v1479_v2  ;;  %v1492_v5 = vadd.f32 %v1491_v60, %v1478_v61  ;;  %v1932_v49 = vmov 1966171168   ;;  %vm1586_vm2 = vcmp.lt.s32.totalorder %v1523_v62, 512 }
 0x359   : > { %v1484_v51 = vrot.slane %v1483_v0, 4  ;;  %v1510_v6 = vadd.f32 %v1509_v63, %v1480_v3  ;;  %v1526_v28 = vrot.slane %v1521_v21, %v1525_v18  ;;  %v1562_v52 = vunpack.c.l.s4 %v1932_v49 }
 0x35a   : > { %v1502_v7 = vrot.slane %v1501_v4, 4  ;;  %v1493_v8 = vrot.slane %v1492_v5, 4 }
 0x35b   : > { %v1485_v10 = vadd.f32 %v1484_v51, %v1483_v0  ;;  %v1511_v11 = vrot.slane %v1510_v6, 4  ;;  %v1563_v53 = vunpack.c.0.s8 %v1562_v52 }
 0x35c   : > { %v1503_v12 = vadd.f32 %v1502_v7, %v1501_v4  ;;  %v1494_v13 = vadd.f32 %v1493_v8, %v1492_v5 }
 0x35d   : > { %v1486_v14 = vrot.slane %v1485_v10, 2  ;;  %v1512_v15 = vadd.f32 %v1511_v11, %v1510_v6  ;;  %v1566_v56 = vsub.s32 %v1563_v53, %v1524_v9 }
 0x35e   : > { %v1504_v16 = vrot.slane %v1503_v12, 2  ;;  %v1495_v17 = vrot.slane %v1494_v13, 2 }
 0x35f   : > { %v1487_v19 = vadd.f32 %v1486_v14, %v1485_v10  ;;  %v1513_v20 = vrot.slane %v1512_v15, 2 }
 0x360   : > { %v1505_v22 = vadd.f32 %v1504_v16, %v1503_v12  ;;  %v1496_v23 = vadd.f32 %v1495_v17, %v1494_v13 }
 0x361   : > { %v1488_v24 = vrot.slane %v1487_v19, 1  ;;  %v1514_v25 = vadd.f32 %v1513_v20, %v1512_v15 }
 0x362   : > { %v1506_v26 = vrot.slane %v1505_v22, 1  ;;  %v1497_v27 = vrot.slane %v1496_v23, 1 }
 0x363   : > { %v1489_v29 = vadd.f32 %v1488_v24, %v1487_v19  ;;  %v1515_v30 = vrot.slane %v1514_v25, 1 }
 0x364   : > { %v1507_v31 = vadd.f32 %v1506_v26, %v1505_v22  ;;  %v1498_v32 = vadd.f32 %v1497_v27, %v1496_v23 }
 0x365   : > { %v1527_v33 = vadd.f32 %v1526_v28, %v1489_v29  ;;  %v1516_v34 = vadd.f32 %v1515_v30, %v1514_v25 }
 0x366   : > { %v1529_v35 = vadd.f32 %v1526_v28, %v1507_v31  ;;  %v1528_v36 = vadd.f32 %v1526_v28, %v1498_v32 }
 0x367   : > { %v1704_v37 = vmul.f32 -1.442695, %v1527_v33  ;;  %v1530_v1 = vadd.f32 %v1526_v28, %v1516_v34 }
 0x368   : > { %v1706_v38 = vmul.f32 -1.442695, %v1529_v35  ;;  %v1705_v39 = vmul.f32 -1.442695, %v1528_v36 }
 0x369   : > { %1851 = vpow2.f32 %v1704_v37  ;;  %v1707_v40 = vmul.f32 -1.442695, %v1530_v1 }
 0x36a   : > { %1853 = vpow2.f32 %v1706_v38 }
 0x36b   : > { %1855 = vpow2.f32 %v1705_v39 }
 0x36c   : > { %1857 = vpow2.f32 %v1707_v40 }
 0x373   : > { %v1852_v41 = vpop.eup %1851 }
 0x374   : > { %v1854_v42 = vpop.eup %1853  ;;  %v1543_v43 = vadd.f32 1.0, %v1852_v41 }
 0x375   : > { %v1856_v44 = vpop.eup %1855  ;;  %v1545_v45 = vadd.f32 1.0, %v1854_v42 }
 0x376   : > { %v1858_v46 = vpop.eup %1857  ;;  %1859 = vrcp.f32 %v1543_v43  ;;  %v1544_v47 = vadd.f32 1.0, %v1856_v44 }
 0x377   : > { %1861 = vrcp.f32 %v1545_v45  ;;  %v1546_v48 = vadd.f32 1.0, %v1858_v46 }
 0x378   : > { %1863 = vrcp.f32 %v1544_v47 }
 0x379   : > { %1865 = vrcp.f32 %v1546_v48 }
 0x380   : > { %v1860_v54 = vpop.eup %1859 }
 0x381   : > { %v1862_v55 = vpop.eup %1861 }
 0x382   : > { %v1864_v50 = vpop.eup %1863 }
 0x383   : > { %v1866_v57 = vpop.eup %1865  ;;  %v1559_v58 = vcombine.low %v1860_v54, %v1864_v50 }
 0x384   : > { %v1560_v59 = vcombine.low %v1862_v55, %v1866_v57 }
 0x385   : > { %v1567_v60 = vrot.slane %v1559_v58, %v1566_v56 }
 0x386   : > { %v1574_v2 = vrot.slane %v1560_v59, %v1566_v56 }
 0x388   : > { %v1575_v61 = vcombine.low %v1567_v60, %v1574_v2 }
 0x38a   : > { %v1582_v63 = vrot.slane %v1575_v61, %v1566_v56 }
 0x38c   : > { %1588 = vst.msk [vmem:[%s340_s18] sm:$0xf] %vm1586_vm2, %v1582_v63 }
 0x38d   : > { %1880 = shalt.err (!%p1877_p3)
}
 0x38e   : > { %s1881_s22 = scalar_lea.hbm %s2382_s29, 64  ;;  %s1885_s17 = scalar_lea.hbm %s2433_s9, 128 }
 0x38f   : > { %p1882_p4 = scmp.ne.s32.totalorder %s2382_s29, %s1881_s22  ;;  %p1886_p9 = scmp.lt.u32.totalorder %s2382_s29, %s2433_s9 }
 0x390   : > { %p1887_p10 = scmp.lt.u32.totalorder %s1885_s17, %s1881_s22  ;;  %p1889_p12 = scmp.lt.u32.totalorder %s1881_s22, %s2382_s29 }
 0x391   : > { %p1883_p7 = pnand %p1882_p4, %p2022_p5 }
 0x392   : > { %p1888_p11 = por %p1887_p10, %p1886_p9 }
 0x393   : > { %p1884_p8 = pneg %p1883_p7 }
 0x394   : > { %p1890_p13 = por %p1889_p12, %p1888_p11 }
 0x396   : > { %p1891_p0 = pnand %p1890_p13, %p1884_p8 }
 0x398   : > { %1894 = shalt.err (!%p1891_p0)
}
 0x399   : > { %1794 = dma.vmem_to_hbm [thread:$0]  (%p2022_p5), %s2384_s23, 64, %s2382_s29, %s1590_s26  }
 0x39a PF: > { %p1800_p1 = scmp.ge.s32.totalorder %s1929_s14, 2  ;;  %s1616_s25 = sand.u32 1, %s1917_s11  }
 0x39b   : > { %s1617_s27 = scalar_lea.sflag [#allocation4], %s1616_s25 }
 0x39c   : > { %p1797_p2 = pnand %p1800_p1, %p2026_p6 }
 0x39e   : > { %1912 = dma.done.wait (!%p1797_p2), %s1617_s27, 64  }
 0x39f   : > { %1914 = vsyncadd (!%p1797_p2), %s1617_s27, 4294967232  ;;  %p21_p3 = scmp.ge.s32.totalorder %s2010_s16, 4   ;;  %s2436_s11 = smov %s1921_s12 }
 0x3a0   : > { %s2437_s12 = smov %s1925_s13  ;;  %s2438_s13 = smov %s2020_s19 }
 0x3a1   : > { %s2439_s14 = smov %s2010_s16  ;;  %23 = sbr.rel (!%p21_p3) target bundleno = 6 (0x6), region = 91 }
 0x3a8   :  { %1622 = vsyncpa [#allocation4], 1 }
 0x3a9   :  { %1624 = vsyncpa [#allocation4 + $0x1], 1 }

</bundles_post_ra>
